<compile_context>
chip_gen: v5e
topology: v5e:2x2
jax: 0.10.0
libtpu: 0.0.40
codegen_flags: <defaults>
</compile_context>

<pallas_src>
import math

import jax
import jax.numpy as jnp
from jax import lax
from jax.experimental import pallas as pl
from jax.experimental.pallas import tpu as pltpu

_SMOOTH = 1e-6
_LANES = 128
# Minimal sublane multiple per itemsize: f32 -> 8, bf16/f16 -> 16, int8/fp8 -> 32.
_SUBLANE = {4: 8, 2: 16, 1: 32}


def _make_kernel(alpha, block_rows, lanes, binary_targets):
    def kernel(t_ref, p_ref, num_ref, w_ref, acc_num, acc_w):
        i = pl.program_id(1)

        @pl.when(i == 0)
        def _():
            acc_num[...] = jnp.zeros_like(acc_num)
            acc_w[...] = jnp.zeros_like(acc_w)

        t = t_ref[...].astype(jnp.float32)
        p = p_ref[...].astype(jnp.float32)

        # w = round(|y_true - y_pred| + alpha)  (round-half-to-even, same as torch)
        w = jnp.round(jnp.abs(t - p) + alpha)

        if binary_targets:
            # Valid only for hard {0,1} targets: one EUP log instead of two.
            log_val = jnp.log(jnp.where(t > 0.5, p, 1.0 - p) + _SMOOTH)
            term = w * (t + w * (1.0 - t)) * log_val
        else:
            term = w * (t * jnp.log(p + _SMOOTH)
                        + w * (1.0 - t) * jnp.log(1.0 - p + _SMOOTH))

        # Fold the (block_rows, lanes) tile into (8, lanes) accumulators.
        # Same number of VPU adds as a full-block accumulator, but only one
        # accumulator vreg load + store per input vreg per step.
        acc_num[...] += term.reshape(block_rows // 8, 8, lanes).sum(axis=0)
        acc_w[...] += w.reshape(block_rows // 8, 8, lanes).sum(axis=0)

        @pl.when(i == pl.num_programs(1) - 1)
        def _():
            num_ref[...] = acc_num[...]
            w_ref[...] = acc_w[...]

    return kernel


def _jax_partial(t, p, alpha):
    """Plain-JAX numerator / w-sum for the (small) ragged tail."""
    t = t.astype(jnp.float32)
    p = p.astype(jnp.float32)
    w = jnp.round(jnp.abs(t - p) + alpha)
    num = jnp.sum(w * (t * jnp.log(p + _SMOOTH)
                       + w * (1.0 - t) * jnp.log(1.0 - p + _SMOOTH)))
    return num, jnp.sum(w)


def cut_crossentry(y_true, y_pred, alpha=0.4, *, block_rows=4096, num_shards=1,
                   binary_targets=False):
    """Pallas TPU implementation of cut_crossentry.forward.

    Returns (loss, sum_w); sum_w is the value the torch module prints.
    Use num_shards=2 on v7x (2 TensorCores/chip); leave 1 on v5e/v6e.
    """
    assert y_true.shape == y_pred.shape
    n = math.prod(y_true.shape)
    lanes = _LANES
    alpha = float(alpha)

    # Sublane multiple must respect both input dtypes' (sub, 128) tiling.
    sub = max(_SUBLANE.get(jnp.dtype(y_true.dtype).itemsize, 8),
              _SUBLANE.get(jnp.dtype(y_pred.dtype).itemsize, 8))

    t_flat = jnp.ravel(y_true)   # native dtype; cast to f32 inside the kernel
    p_flat = jnp.ravel(y_pred)

    rows_all = n // lanes
    br = min(block_rows, rows_all // max(num_shards, 1))
    br = (br // sub) * sub       # round down to the sublane multiple

    num = jnp.float32(0.0)
    wsum = jnp.float32(0.0)
    n_main = 0

    if br >= sub:
        inner_steps = rows_all // (num_shards * br)
        rows_main = num_shards * inner_steps * br
        n_main = rows_main * lanes

        t2d = t_flat[:n_main].reshape(rows_main, lanes)
        p2d = p_flat[:n_main].reshape(rows_main, lanes)

        kernel = _make_kernel(alpha, br, lanes, binary_targets)

        if num_shards > 1:
            dim_sem = (pltpu.CORE_PARALLEL, pltpu.ARBITRARY)   # v7x: 2 TCs
        else:
            dim_sem = (pltpu.ARBITRARY, pltpu.ARBITRARY)

        bytes_in = n_main * (jnp.dtype(y_true.dtype).itemsize
                             + jnp.dtype(y_pred.dtype).itemsize)
        cost = pl.CostEstimate(
            flops=17 * n_main,
            transcendentals=(1 if binary_targets else 2) * n_main,
            bytes_accessed=bytes_in + 2 * num_shards * 8 * lanes * 4,
        )

        partial_num, partial_w = pl.pallas_call(
            kernel,
            out_shape=(
                jax.ShapeDtypeStruct((num_shards * 8, lanes), jnp.float32),
                jax.ShapeDtypeStruct((num_shards * 8, lanes), jnp.float32),
            ),
            grid_spec=pltpu.PrefetchScalarGridSpec(
                num_scalar_prefetch=0,
                grid=(num_shards, inner_steps),
                in_specs=[
                    pl.BlockSpec((br, lanes), lambda c, i: (c * inner_steps + i, 0)),
                    pl.BlockSpec((br, lanes), lambda c, i: (c * inner_steps + i, 0)),
                ],
                out_specs=[
                    pl.BlockSpec((8, lanes), lambda c, i: (c, 0)),
                    pl.BlockSpec((8, lanes), lambda c, i: (c, 0)),
                ],
                scratch_shapes=[
                    pltpu.VMEM((8, lanes), jnp.float32),
                    pltpu.VMEM((8, lanes), jnp.float32),
                ],
            ),
            compiler_params=pltpu.CompilerParams(
                dimension_semantics=dim_sem,
                vmem_limit_bytes=32 * 1024 * 1024,
            ),
            cost_estimate=cost,
        )(t2d, p2d)

        num = jnp.sum(partial_num)
        wsum = jnp.sum(partial_w)

    if n_main < n:
        # Ragged tail (< one block): plain JAX, at most block_rows*128 elems.
        num_t, wsum_t = _jax_partial(t_flat[n_main:], p_flat[n_main:], alpha)
        num = num + num_t
        wsum = wsum + wsum_t

    # sum(w + smooth) over the n original elements == sum(w) + n * smooth
    loss = -num / (wsum + jnp.float32(n) * jnp.float32(_SMOOTH))
    # TODO(synk): torch prints sum(w) as a side effect; we return it instead.
    return loss, wsum


def _reference(y_true, y_pred, alpha=0.4):
    smooth = 1e-6
    y_true = y_true.astype(jnp.float32)
    y_pred = y_pred.astype(jnp.float32)
    w = jnp.round(jnp.abs(y_true - y_pred) + alpha)
    num = jnp.sum(w * (y_true * jnp.log(y_pred + smooth)
                       + w * (1.0 - y_true) * jnp.log(1.0 - y_pred + smooth)))
    return -num / jnp.sum(w + smooth), jnp.sum(w)


if __name__ == "__main__":
    key = jax.random.PRNGKey(0)

    # Test 1: small NCHW segmentation-style batch, exact block-multiple path.
    kt, kp = jax.random.split(key)
    shape = (2, 4, 16, 16)   # 2048 elements
    y_true = (jax.random.uniform(kt, shape) > 0.7).astype(jnp.float32)
    y_pred = jax.nn.sigmoid(jax.random.normal(kp, shape, dtype=jnp.float32))

    loss, wsum = cut_crossentry(y_true, y_pred, alpha=0.4)
    loss = jax.block_until_ready(loss)
    ref_loss, ref_wsum = _reference(y_true, y_pred, alpha=0.4)
    assert jnp.allclose(loss, ref_loss, rtol=1e-5, atol=1e-6), (loss, ref_loss)
    assert jnp.allclose(wsum, ref_wsum, rtol=1e-6, atol=1e-2), (wsum, ref_wsum)

    # Test 2: ragged size -> multi-step grid plus plain-JAX tail.
    kt2, kp2 = jax.random.split(kp)
    shape2 = (2, 4, 33, 45)  # 11880 elements (not a multiple of 128)
    y_true2 = (jax.random.uniform(kt2, shape2) > 0.6).astype(jnp.float32)
    y_pred2 = jax.nn.sigmoid(jax.random.normal(kp2, shape2, dtype=jnp.float32))

    loss2, wsum2 = cut_crossentry(y_true2, y_pred2, alpha=0.4, block_rows=8)
    loss2 = jax.block_until_ready(loss2)
    ref_loss2, ref_wsum2 = _reference(y_true2, y_pred2, alpha=0.4)
    assert jnp.allclose(loss2, ref_loss2, rtol=1e-4, atol=1e-6), (loss2, ref_loss2)
    assert jnp.allclose(wsum2, ref_wsum2, rtol=1e-6, atol=1e-1), (wsum2, ref_wsum2)

    print("KERNEL_OK")
</pallas_src>

<mosaic_0001>
module attributes {stable_mosaic.version = 11 : i64} {
  func.func @kernel(%arg0: i32, %arg1: i32, %arg2: memref<16x128xf32, #tpu.memory_space<vmem>>, %arg3: memref<16x128xf32, #tpu.memory_space<vmem>>, %arg4: memref<8x128xf32, #tpu.memory_space<vmem>>, %arg5: memref<8x128xf32, #tpu.memory_space<vmem>>, %arg6: memref<8x128xf32, #tpu.memory_space<vmem>>, %arg7: memref<8x128xf32, #tpu.memory_space<vmem>>) attributes {dimension_semantics = [#tpu.dimension_semantics<arbitrary>, #tpu.dimension_semantics<arbitrary>], iteration_bounds = array<i64: 1, 1>, scalar_prefetch = 0 : i64, scratch_operands = 2 : i64, tpu.core_type = #tpu.core_type<tc>, window_params = [{transform_indices = @transform_0, window_bounds = array<i64: 16, 128>}, {transform_indices = @transform_1, window_bounds = array<i64: 16, 128>}, {transform_indices = @transform_2, window_bounds = array<i64: 8, 128>}, {transform_indices = @transform_3, window_bounds = array<i64: 8, 128>}]} {
    %c0_i32 = arith.constant 0 : i32
    %0 = arith.cmpi eq, %arg1, %c0_i32 : i32
    %1 = arith.extui %0 : i1 to i32
    %c0_i32_0 = arith.constant 0 : i32
    %2 = arith.cmpi ne, %1, %c0_i32_0 : i32
    scf.if %2 {
      %cst_20 = arith.constant 0.000000e+00 : f32
      %38 = vector.broadcast %cst_20 : f32 to vector<8x128xf32>
      %c0_21 = arith.constant 0 : index
      %c0_22 = arith.constant 0 : index
      %39 = vector.load %arg6[%c0_21, %c0_22] : memref<8x128xf32, #tpu.memory_space<vmem>>, vector<8x128xf32>
      tpu.vector_store %arg6[%c0_21, %c0_22], %38 {strides = array<i32>} : memref<8x128xf32, #tpu.memory_space<vmem>>, vector<8x128xf32>,
      %cst_23 = arith.constant 0.000000e+00 : f32
      %40 = vector.broadcast %cst_23 : f32 to vector<8x128xf32>
      %c0_24 = arith.constant 0 : index
      %c0_25 = arith.constant 0 : index
      %41 = vector.load %arg7[%c0_24, %c0_25] : memref<8x128xf32, #tpu.memory_space<vmem>>, vector<8x128xf32>
      tpu.vector_store %arg7[%c0_24, %c0_25], %40 {strides = array<i32>} : memref<8x128xf32, #tpu.memory_space<vmem>>, vector<8x128xf32>,
    } else {
    }
    %c0 = arith.constant 0 : index
    %c0_1 = arith.constant 0 : index
    %3 = vector.load %arg2[%c0, %c0_1] : memref<16x128xf32, #tpu.memory_space<vmem>>, vector<16x128xf32>
    %c0_2 = arith.constant 0 : index
    %c0_3 = arith.constant 0 : index
    %4 = vector.load %arg3[%c0_2, %c0_3] : memref<16x128xf32, #tpu.memory_space<vmem>>, vector<16x128xf32>
    %5 = arith.subf %3, %4 : vector<16x128xf32>
    %6 = math.absf %5 : vector<16x128xf32>
    %cst = arith.constant 4.000000e-01 : f32
    %7 = vector.broadcast %cst : f32 to vector<16x128xf32>
    %8 = arith.addf %6, %7 : vector<16x128xf32>
    %9 = math.roundeven %8 : vector<16x128xf32>
    %cst_4 = arith.constant 9.99999997E-7 : f32
    %10 = vector.broadcast %cst_4 : f32 to vector<16x128xf32>
    %11 = arith.addf %4, %10 : vector<16x128xf32>
    %12 = math.log %11 : vector<16x128xf32>
    %13 = arith.mulf %3, %12 : vector<16x128xf32>
    %cst_5 = arith.constant 1.000000e+00 : f32
    %14 = vector.broadcast %cst_5 : f32 to vector<16x128xf32>
    %15 = arith.subf %14, %3 : vector<16x128xf32>
    %16 = arith.mulf %9, %15 : vector<16x128xf32>
    %cst_6 = arith.constant 1.000000e+00 : f32
    %17 = vector.broadcast %cst_6 : f32 to vector<16x128xf32>
    %18 = arith.subf %17, %4 : vector<16x128xf32>
    %cst_7 = arith.constant 9.99999997E-7 : f32
    %19 = vector.broadcast %cst_7 : f32 to vector<16x128xf32>
    %20 = arith.addf %18, %19 : vector<16x128xf32>
    %21 = math.log %20 : vector<16x128xf32>
    %22 = arith.mulf %16, %21 : vector<16x128xf32>
    %23 = arith.addf %13, %22 : vector<16x128xf32>
    %24 = arith.mulf %9, %23 : vector<16x128xf32>
    %c0_8 = arith.constant 0 : index
    %c0_9 = arith.constant 0 : index
    %25 = vector.load %arg6[%c0_8, %c0_9] : memref<8x128xf32, #tpu.memory_space<vmem>>, vector<8x128xf32>
    %26 = vector.shape_cast %24 : vector<16x128xf32> to vector<2x8x128xf32>
    %cst_10 = arith.constant dense<0.000000e+00> : vector<8x128xf32>
    %27 = vector.multi_reduction <add>, %26, %cst_10 [0] : vector<2x8x128xf32> to vector<8x128xf32>
    %28 = arith.addf %25, %27 : vector<8x128xf32>
    %c0_11 = arith.constant 0 : index
    %c0_12 = arith.constant 0 : index
    %29 = vector.load %arg6[%c0_11, %c0_12] : memref<8x128xf32, #tpu.memory_space<vmem>>, vector<8x128xf32>
    tpu.vector_store %arg6[%c0_11, %c0_12], %28 {strides = array<i32>} : memref<8x128xf32, #tpu.memory_space<vmem>>, vector<8x128xf32>,
    %c0_13 = arith.constant 0 : index
    %c0_14 = arith.constant 0 : index
    %30 = vector.load %arg7[%c0_13, %c0_14] : memref<8x128xf32, #tpu.memory_space<vmem>>, vector<8x128xf32>
    %31 = vector.shape_cast %9 : vector<16x128xf32> to vector<2x8x128xf32>
    %cst_15 = arith.constant dense<0.000000e+00> : vector<8x128xf32>
    %32 = vector.multi_reduction <add>, %31, %cst_15 [0] : vector<2x8x128xf32> to vector<8x128xf32>
    %33 = arith.addf %30, %32 : vector<8x128xf32>
    %c0_16 = arith.constant 0 : index
    %c0_17 = arith.constant 0 : index
    %34 = vector.load %arg7[%c0_16, %c0_17] : memref<8x128xf32, #tpu.memory_space<vmem>>, vector<8x128xf32>
    tpu.vector_store %arg7[%c0_16, %c0_17], %33 {strides = array<i32>} : memref<8x128xf32, #tpu.memory_space<vmem>>, vector<8x128xf32>,
    %c0_i32_18 = arith.constant 0 : i32
    %35 = arith.cmpi eq, %arg1, %c0_i32_18 : i32
    %36 = arith.extui %35 : i1 to i32
    %c0_i32_19 = arith.constant 0 : i32
    %37 = arith.cmpi ne, %36, %c0_i32_19 : i32
    scf.if %37 {
      %c0_20 = arith.constant 0 : index
      %c0_21 = arith.constant 0 : index
      %38 = vector.load %arg6[%c0_20, %c0_21] : memref<8x128xf32, #tpu.memory_space<vmem>>, vector<8x128xf32>
      %c0_22 = arith.constant 0 : index
      %c0_23 = arith.constant 0 : index
      %39 = vector.load %arg4[%c0_22, %c0_23] : memref<8x128xf32, #tpu.memory_space<vmem>>, vector<8x128xf32>
      tpu.vector_store %arg4[%c0_22, %c0_23], %38 {strides = array<i32>} : memref<8x128xf32, #tpu.memory_space<vmem>>, vector<8x128xf32>,
      %c0_24 = arith.constant 0 : index
      %c0_25 = arith.constant 0 : index
      %40 = vector.load %arg7[%c0_24, %c0_25] : memref<8x128xf32, #tpu.memory_space<vmem>>, vector<8x128xf32>
      %c0_26 = arith.constant 0 : index
      %c0_27 = arith.constant 0 : index
      %41 = vector.load %arg5[%c0_26, %c0_27] : memref<8x128xf32, #tpu.memory_space<vmem>>, vector<8x128xf32>
      tpu.vector_store %arg5[%c0_26, %c0_27], %40 {strides = array<i32>} : memref<8x128xf32, #tpu.memory_space<vmem>>, vector<8x128xf32>,
    } else {
    }
    return
  }
  func.func @transform_0(%arg0: i32, %arg1: i32) -> (i32, i32) {
    %c1_i32 = arith.constant 1 : i32
    %0 = arith.muli %arg0, %c1_i32 : i32
    %1 = arith.addi %0, %arg1 : i32
    %c0_i32 = arith.constant 0 : i32
    %c0_i32_0 = arith.constant 0 : i32
    return %1, %c0_i32 : i32, i32
  }
  func.func @transform_1(%arg0: i32, %arg1: i32) -> (i32, i32) {
    %c1_i32 = arith.constant 1 : i32
    %0 = arith.muli %arg0, %c1_i32 : i32
    %1 = arith.addi %0, %arg1 : i32
    %c0_i32 = arith.constant 0 : i32
    %c0_i32_0 = arith.constant 0 : i32
    return %1, %c0_i32 : i32, i32
  }
  func.func @transform_2(%arg0: i32, %arg1: i32) -> (i32, i32) {
    %c0_i32 = arith.constant 0 : i32
    %c0_i32_0 = arith.constant 0 : i32
    return %arg0, %c0_i32 : i32, i32
  }
  func.func @transform_3(%arg0: i32, %arg1: i32) -> (i32, i32) {
    %c0_i32 = arith.constant 0 : i32
    %c0_i32_0 = arith.constant 0 : i32
    return %arg0, %c0_i32 : i32, i32
  }
}

</mosaic_0001>

<bundles_post_ra>
// kernel: tpu_custom_call.1
= control target key start
LH: loop header
LB: loop body
LE: loop exit
PB: predicated region body
PF: predicated region fallthrough
CT: control target
= control target key end

     0   :  { %9 = vsyncpa [#allocation5], 0  ;;  %s324_s0 = inlined_call_operand.hbm [shape: f32[16,128], index: 0, kind: input, shape index: {}]   ;;  %s325_s1 = inlined_call_operand.hbm [shape: f32[16,128], index: 1, kind: input, shape index: {}]   ;;  %s326_s2 = inlined_call_operand.hbm [shape: f32[8,128], index: 2, kind: output, shape index: {0}]   ;;  %s327_s3 = inlined_call_operand.hbm [shape: f32[8,128], index: 3, kind: output, shape index: {1}]  }
   0x1   :  { %10 = vsyncpa [#allocation8], 0 }
   0x2   :  { %11 = vsyncpa [#allocation6], 0 }
   0x3   :  { %12 = vsyncpa [#allocation11], 0  ;;  %s21_s14 = sshll.u32 %s324_s0, 4  ;;  %s286_s15 = smov [#allocation4]   ;;  %s22_s14 = int_to_ptr.hbm [resolvable:$true] %s21_s14 }
   0x4   :  { %s23_s16 = sshll.u32 %s286_s15, 4  ;;  %s38_s19 = sshll.u32 %s325_s1, 4  ;;  %s24_s16 = int_to_ptr.vmem [resolvable:$true] %s23_s16  ;;  %s39_s19 = int_to_ptr.hbm [resolvable:$true] %s38_s19 }
   0x5   :  { %s287_s20 = smov 128   ;;  %s288_s21 = smov 8  }
   0x6   :  { %29 = dma.hbm_to_vmem [thread:$0]  %s22_s14, 256, %s24_s16, [#allocation5], %s287_s20, %s287_s20, %s288_s21  }
   0x7   :  { %s289_s22 = smov [#allocation7]  }
   0x8   :  { %s40_s23 = sshll.u32 %s289_s22, 4  ;;  %s41_s23 = int_to_ptr.vmem [resolvable:$true] %s40_s23 }
   0x9   :  { %46 = dma.hbm_to_vmem [thread:$0]  %s39_s19, 256, %s41_s23, [#allocation8], %s287_s20, %s287_s20, %s288_s21  }
   0xa   :  { %278 = dma.done.wait [#allocation5], 256  }
   0xb   :  { %279 = vsyncadd [#allocation5], 4294967040 }
   0xc   :  { %280 = dma.done.wait [#allocation8], 256  }
   0xd   :  { %281 = vsyncadd [#allocation8], 4294967040  ;;  %v65_v0 = vld [vmem:[#allocation4] sm:$0xff]  ;;  %v66_v1 = vld [vmem:[#allocation4 + $0x8] sm:$0xff]  ;;  %s290_s0 = smov [#allocation10]   ;;  %s136_s26 = sshll.u32 %s327_s3, 4  ;;  %s137_s26 = int_to_ptr.hbm [resolvable:$true] %s136_s26 }
   0xe   :  { %v67_v2 = vld [vmem:[#allocation7] sm:$0xff]  ;;  %v68_v3 = vld [vmem:[#allocation7 + $0x8] sm:$0xff]  ;;  %v85_v30 = vsub.f32 1.0, %v65_v0  ;;  %v86_v34 = vsub.f32 1.0, %v66_v1  ;;  %s134_s1 = sshll.u32 %s290_s0, 4  ;;  %s291_s27 = smov [#allocation9]   ;;  %s135_s1 = int_to_ptr.vmem [resolvable:$true] %s134_s1 }
   0xf   :  { %v69_v4 = vsub.f32 %v65_v0, %v67_v2  ;;  %v77_v5 = vadd.f32 1e-06, %v67_v2  ;;  %v70_v6 = vsub.f32 %v66_v1, %v68_v3  ;;  %v78_v7 = vadd.f32 1e-06, %v68_v3  ;;  %s123_s28 = sshll.u32 %s291_s27, 4  ;;  %s125_s30 = sshll.u32 %s326_s2, 4  ;;  %s124_s28 = int_to_ptr.vmem [resolvable:$true] %s123_s28  ;;  %s126_s30 = int_to_ptr.hbm [resolvable:$true] %s125_s30 }
  0x10   :  { %v89_v8 = vsub.f32 1.0, %v67_v2  ;;  %v90_v9 = vsub.f32 1.0, %v68_v3 }
  0x11   :  { %v71_v10 = vand.u32 2147483647, %v69_v4  ;;  %174 = vlog2.f32 %v77_v5  ;;  %v72_v11 = vand.u32 2147483647, %v70_v6 }
  0x12   :  { %176 = vlog2.f32 %v78_v7  ;;  %v91_v12 = vadd.f32 1e-06, %v89_v8  ;;  %v92_v13 = vadd.f32 1e-06, %v90_v9 }
  0x13   :  { %v73_v14 = vadd.f32 0.4, %v71_v10  ;;  %v74_v15 = vadd.f32 0.4, %v72_v11 }
  0x14   :  { %178 = vlog2.f32 %v91_v12 }
  0x15   :  { %v154_v16 = vcvt.f32.s32 %v73_v14  ;;  %180 = vlog2.f32 %v92_v13  ;;  %v152_v17 = vand.u32 2147483647, %v73_v14  ;;  %v162_v18 = vcvt.f32.s32 %v74_v15 }
  0x16   :  { %v157_v21 = vand.u32 2147483648, %v73_v14  ;;  %v160_v22 = vand.u32 2147483647, %v74_v15  ;;  %v165_v25 = vand.u32 2147483648, %v74_v15 }
  0x17   :  { %v175_v19 = vpop.eup %174  ;;  %v155_v20 = vcvt.s32.f32 %v154_v16  ;;  %v163_v24 = vcvt.s32.f32 %v162_v18  ;;  %vm153_vm0 = vcmp.lt.f32.partialorder %v152_v17, 8388608.0 }
  0x18   :  { %v177_v23 = vpop.eup %176  ;;  %v80_v29 = vmul.f32 0.6931472, %v175_v19  ;;  %vm161_vm1 = vcmp.lt.f32.partialorder %v160_v22, 8388608.0 }
  0x19   :  { %v156_v26 = vand.u32 2147483647, %v155_v20  ;;  %v164_v28 = vand.u32 2147483647, %v163_v24  ;;  %v82_v33 = vmul.f32 0.6931472, %v177_v23 }
  0x1a   :  { %v179_v27 = vpop.eup %178  ;;  %v83_v40 = vmul.f32 %v80_v29, %v65_v0 }
  0x1b   :  { %v181_v31 = vpop.eup %180  ;;  %v158_v32 = vor.u32 %v157_v21, %v156_v26  ;;  %v166_v35 = vor.u32 %v165_v25, %v164_v28  ;;  %v94_v36 = vmul.f32 0.6931472, %v179_v27  ;;  %v84_v42 = vmul.f32 %v82_v33, %v66_v1 }
  0x1c   :  { %v96_v38 = vmul.f32 0.6931472, %v181_v31 }
  0x1d   :  { %v159_v37 = vsel %vm153_vm0, %v158_v32, %v73_v14  ;;  %v167_v39 = vsel %vm161_vm1, %v166_v35, %v74_v15 }
  0x1e   :  { %v87_v41 = vmul.f32 %v159_v37, %v85_v30  ;;  %v88_v43 = vmul.f32 %v167_v39, %v86_v34  ;;  %v108_v44 = vadd.f32 %v167_v39, %v159_v37 }
  0x20   :  { %v97_v45 = vmul.f32 %v94_v36, %v87_v41  ;;  %v98_v46 = vmul.f32 %v96_v38, %v88_v43  ;;  %117 = vst [vmem:[#allocation10] sm:$0xff] %v108_v44 }
  0x21   :  { %139 = dma.vmem_to_hbm [thread:$0]  %s135_s1, 128, %s137_s26, [#allocation11]  }
  0x22   :  { %v99_v47 = vadd.f32 %v97_v45, %v83_v40  ;;  %v100_v48 = vadd.f32 %v98_v46, %v84_v42 }
  0x24   :  { %v101_v49 = vmul.f32 %v159_v37, %v99_v47  ;;  %v102_v50 = vmul.f32 %v167_v39, %v100_v48 }
  0x26   :  { %v104_v51 = vadd.f32 %v102_v50, %v101_v49 }
  0x28   :  { %115 = vst [vmem:[#allocation9] sm:$0xff] %v104_v51 }
  0x29   :  { %128 = dma.vmem_to_hbm [thread:$0]  %s124_s28, 128, %s126_s30, [#allocation6]  }
  0x2a   :  { %282 = dma.done.wait [#allocation6], 128  }
  0x2b   :  { %283 = vsyncadd [#allocation6], 4294967168 }
  0x2c   :  { %284 = dma.done.wait [#allocation11], 128  }
  0x2d   :  { %285 = vsyncadd [#allocation11], 4294967168 }
  0x2e   :  { %148 = vsyncpa [#allocation5], 1 }
  0x2f   :  { %149 = vsyncpa [#allocation8], 1 }
  0x30   :  { %150 = vsyncpa [#allocation6], 1 }
  0x31   :  { %151 = vsyncpa [#allocation11], 1 }

</bundles_post_ra>
